<compile_context>
chip_gen: v5e
topology: v5e:2x2
jax: 0.10.0
libtpu: 0.0.40
codegen_flags: <defaults>
</compile_context>

<pallas_src>
import jax
import jax.numpy as jnp
from jax.experimental import pallas as pl
from jax.experimental.pallas import tpu as pltpu

LANE = 128     # TPU lane width (last dim)
SUBLANE = 8    # TPU sublane width (second-to-last dim, f32)


def _round_up(n, m):
    return ((n + m - 1) // m) * m


# --------------------------------------------------------------------------
# Kernel: whole 3-layer MLP fused, all operands lane-dense in VMEM.
# --------------------------------------------------------------------------
def actor_kernel(x_ref, w1_ref, b1_ref, w2_ref, b2_ref, w3_ref, b3_ref, out_ref):
    # fc1 + leaky_relu (slope 0.01 = F.leaky_relu default)
    h = jnp.dot(x_ref[...], w1_ref[...], preferred_element_type=jnp.float32)
    h = h + b1_ref[...]
    h = jnp.maximum(h, 0.01 * h)
    # fc2 + leaky_relu
    h = jnp.dot(h, w2_ref[...], preferred_element_type=jnp.float32)
    h = h + b2_ref[...]
    h = jnp.maximum(h, 0.01 * h)
    # fc_act + sigmoid
    h = jnp.dot(h, w3_ref[...], preferred_element_type=jnp.float32)
    h = h + b3_ref[...]
    out_ref[...] = jax.nn.sigmoid(h).astype(out_ref.dtype)


# --------------------------------------------------------------------------
# One-time parameter prep (hoisted out of the per-call path).
# --------------------------------------------------------------------------
def prepare_params(params):
    """PyTorch-layout (out,in) weights -> (in_pad, out_pad) lane-dense f32;
    biases -> (1, out_pad). Call once; reuse the result on every forward."""
    def pad_w(w):                              # (out, in) -> (in_pad, out_pad)
        wt = jnp.asarray(w, jnp.float32).T
        i, o = wt.shape
        return jnp.pad(wt, ((0, _round_up(i, LANE) - i),
                            (0, _round_up(o, LANE) - o)))

    def pad_b(b):                              # (out,) -> (1, out_pad)
        b = jnp.asarray(b, jnp.float32)
        o = b.shape[0]
        return jnp.pad(b, (0, _round_up(o, LANE) - o)).reshape(1, -1)

    return {
        "w1": pad_w(params["fc1_w"]),    "b1": pad_b(params["fc1_b"]),
        "w2": pad_w(params["fc2_w"]),    "b2": pad_b(params["fc2_b"]),
        "w3": pad_w(params["fc_act_w"]), "b3": pad_b(params["fc_act_b"]),
    }


# --------------------------------------------------------------------------
# Forward wrapper: batch grid + VMEM-resident weights.
# --------------------------------------------------------------------------
def actor_forward(x, prepped, n_actions, *, tb=512):
    """x: (B, n_states) f32.  prepped: output of prepare_params()."""
    B, n_states = x.shape
    s_pad, h1_pad = prepped["w1"].shape
    _, h2_pad = prepped["w2"].shape
    _, a_pad = prepped["w3"].shape

    # Batch tile: small batches get one sublane-rounded tile; large batches
    # use fixed `tb`-row tiles pipelined over a 1-D grid.
    tb = min(tb, _round_up(B, SUBLANE))
    b_pad = _round_up(B, tb)

    x_p = x
    if (b_pad, s_pad) != (B, n_states):
        x_p = jnp.pad(x, ((0, b_pad - B), (0, s_pad - n_states)))

    const = lambda i: (0, 0)   # weights/biases: fetched once, VMEM-resident

    out_p = pl.pallas_call(
        actor_kernel,
        out_shape=jax.ShapeDtypeStruct((b_pad, a_pad), jnp.float32),
        grid_spec=pltpu.PrefetchScalarGridSpec(
            num_scalar_prefetch=0,
            grid=(b_pad // tb,),
            in_specs=[
                pl.BlockSpec((tb, s_pad), lambda i: (i, 0)),   # x tile
                pl.BlockSpec((s_pad, h1_pad), const),          # w1
                pl.BlockSpec((1, h1_pad), const),              # b1
                pl.BlockSpec((h1_pad, h2_pad), const),         # w2
                pl.BlockSpec((1, h2_pad), const),              # b2
                pl.BlockSpec((h2_pad, a_pad), const),          # w3
                pl.BlockSpec((1, a_pad), const),               # b3
            ],
            out_specs=pl.BlockSpec((tb, a_pad), lambda i: (i, 0)),
        ),
        compiler_params=pltpu.CompilerParams(
            dimension_semantics=("parallel",),   # shard batch across TCs (v7x)
        ),
    )(x_p, prepped["w1"], prepped["b1"], prepped["w2"], prepped["b2"],
      prepped["w3"], prepped["b3"])

    return out_p[:B, :n_actions]


# --------------------------------------------------------------------------
# Deterministic synthetic init mirroring ActorNet.__init__:
# weights ~ U(-init_w, init_w); biases keep nn.Linear default
# U(-1/sqrt(fan_in), 1/sqrt(fan_in)).
# --------------------------------------------------------------------------
def init_params(key, n_states, n_actions, n_units=(20, 10), init_w=1e-5):
    ks = jax.random.split(key, 6)

    def wu(k, shape):
        return jax.random.uniform(k, shape, jnp.float32, -init_w, init_w)

    def bu(k, shape, fan_in):
        bound = 1.0 / jnp.sqrt(float(fan_in))
        return jax.random.uniform(k, shape, jnp.float32, -bound, bound)

    return {
        "fc1_w": wu(ks[0], (n_units[0], n_states)),
        "fc1_b": bu(ks[1], (n_units[0],), n_states),
        "fc2_w": wu(ks[2], (n_units[1], n_units[0])),
        "fc2_b": bu(ks[3], (n_units[1],), n_units[0]),
        "fc_act_w": wu(ks[4], (n_actions, n_units[1])),
        "fc_act_b": bu(ks[5], (n_actions,), n_units[1]),
    }


def reference_forward(x, params):
    """Pure-JAX reference of the PyTorch forward for a sanity check."""
    h = x @ params["fc1_w"].T + params["fc1_b"]
    h = jnp.maximum(h, 0.01 * h)
    h = h @ params["fc2_w"].T + params["fc2_b"]
    h = jnp.maximum(h, 0.01 * h)
    h = h @ params["fc_act_w"].T + params["fc_act_b"]
    return jax.nn.sigmoid(h)


if __name__ == "__main__":
    key = jax.random.PRNGKey(0)
    k_x, k_p = jax.random.split(key)

    batch, n_states, n_actions = 8, 16, 4
    x = jax.random.normal(k_x, (batch, n_states), jnp.float32)
    params = init_params(k_p, n_states, n_actions, n_units=(20, 10), init_w=1e-5)

    prepped = prepare_params(params)          # transpose + pad ONCE
    out = actor_forward(x, prepped, n_actions)
    out = jax.block_until_ready(out)

    ref = reference_forward(x, params)
    assert out.shape == (batch, n_actions)
    assert jnp.allclose(out, ref, atol=1e-5, rtol=1e-5)

    print("KERNEL_OK")
</pallas_src>

<mosaic_0001>
module attributes {stable_mosaic.version = 11 : i64} {
  func.func @actor_kernel(%arg0: i32, %arg1: memref<8x128xf32, #tpu.memory_space<vmem>>, %arg2: memref<128x128xf32, #tpu.memory_space<vmem>>, %arg3: memref<1x128xf32, #tpu.memory_space<vmem>>, %arg4: memref<128x128xf32, #tpu.memory_space<vmem>>, %arg5: memref<1x128xf32, #tpu.memory_space<vmem>>, %arg6: memref<128x128xf32, #tpu.memory_space<vmem>>, %arg7: memref<1x128xf32, #tpu.memory_space<vmem>>, %arg8: memref<8x128xf32, #tpu.memory_space<vmem>>) attributes {dimension_semantics = [#tpu.dimension_semantics<parallel>], iteration_bounds = array<i64: 1>, scalar_prefetch = 0 : i64, scratch_operands = 0 : i64, tpu.core_type = #tpu.core_type<tc>, window_params = [{transform_indices = @transform_0, window_bounds = array<i64: 8, 128>}, {pipeline_mode = #tpu.pipeline_mode<synchronous>, transform_indices = @transform_1, window_bounds = array<i64: 128, 128>}, {pipeline_mode = #tpu.pipeline_mode<synchronous>, transform_indices = @transform_2, window_bounds = array<i64: 1, 128>}, {pipeline_mode = #tpu.pipeline_mode<synchronous>, transform_indices = @transform_3, window_bounds = array<i64: 128, 128>}, {pipeline_mode = #tpu.pipeline_mode<synchronous>, transform_indices = @transform_4, window_bounds = array<i64: 1, 128>}, {pipeline_mode = #tpu.pipeline_mode<synchronous>, transform_indices = @transform_5, window_bounds = array<i64: 128, 128>}, {pipeline_mode = #tpu.pipeline_mode<synchronous>, transform_indices = @transform_6, window_bounds = array<i64: 1, 128>}, {transform_indices = @transform_7, window_bounds = array<i64: 8, 128>}]} {
    %c0 = arith.constant 0 : index
    %c0_0 = arith.constant 0 : index
    %0 = vector.load %arg1[%c0, %c0_0] : memref<8x128xf32, #tpu.memory_space<vmem>>, vector<8x128xf32>
    %c0_1 = arith.constant 0 : index
    %c0_2 = arith.constant 0 : index
    %1 = vector.load %arg2[%c0_1, %c0_2] : memref<128x128xf32, #tpu.memory_space<vmem>>, vector<128x128xf32>
    %cst = arith.constant dense<0.000000e+00> : vector<8x128xf32>
    %2 = tpu.matmul %0, %1, %cst {dimension_numbers = #tpu.dot_dimension_numbers<[1], [0], [0], [1], [0, 0, 1, 1], [], []>} : vector<8x128xf32>, vector<128x128xf32>, vector<8x128xf32> -> vector<8x128xf32>
    %c0_3 = arith.constant 0 : index
    %c0_4 = arith.constant 0 : index
    %3 = vector.load %arg3[%c0_3, %c0_4] : memref<1x128xf32, #tpu.memory_space<vmem>>, vector<1x128xf32>
    %4 = vector.broadcast %3 : vector<1x128xf32> to vector<8x128xf32>
    %5 = arith.addf %2, %4 : vector<8x128xf32>
    %cst_5 = arith.constant 0.00999999977 : f32
    %6 = vector.broadcast %cst_5 : f32 to vector<8x128xf32>
    %7 = arith.mulf %6, %5 : vector<8x128xf32>
    %8 = arith.maximumf %5, %7 : vector<8x128xf32>
    %c0_6 = arith.constant 0 : index
    %c0_7 = arith.constant 0 : index
    %9 = vector.load %arg4[%c0_6, %c0_7] : memref<128x128xf32, #tpu.memory_space<vmem>>, vector<128x128xf32>
    %cst_8 = arith.constant dense<0.000000e+00> : vector<8x128xf32>
    %10 = tpu.matmul %8, %9, %cst_8 {dimension_numbers = #tpu.dot_dimension_numbers<[1], [0], [0], [1], [0, 0, 1, 1], [], []>} : vector<8x128xf32>, vector<128x128xf32>, vector<8x128xf32> -> vector<8x128xf32>
    %c0_9 = arith.constant 0 : index
    %c0_10 = arith.constant 0 : index
    %11 = vector.load %arg5[%c0_9, %c0_10] : memref<1x128xf32, #tpu.memory_space<vmem>>, vector<1x128xf32>
    %12 = vector.broadcast %11 : vector<1x128xf32> to vector<8x128xf32>
    %13 = arith.addf %10, %12 : vector<8x128xf32>
    %cst_11 = arith.constant 0.00999999977 : f32
    %14 = vector.broadcast %cst_11 : f32 to vector<8x128xf32>
    %15 = arith.mulf %14, %13 : vector<8x128xf32>
    %16 = arith.maximumf %13, %15 : vector<8x128xf32>
    %c0_12 = arith.constant 0 : index
    %c0_13 = arith.constant 0 : index
    %17 = vector.load %arg6[%c0_12, %c0_13] : memref<128x128xf32, #tpu.memory_space<vmem>>, vector<128x128xf32>
    %cst_14 = arith.constant dense<0.000000e+00> : vector<8x128xf32>
    %18 = tpu.matmul %16, %17, %cst_14 {dimension_numbers = #tpu.dot_dimension_numbers<[1], [0], [0], [1], [0, 0, 1, 1], [], []>} : vector<8x128xf32>, vector<128x128xf32>, vector<8x128xf32> -> vector<8x128xf32>
    %c0_15 = arith.constant 0 : index
    %c0_16 = arith.constant 0 : index
    %19 = vector.load %arg7[%c0_15, %c0_16] : memref<1x128xf32, #tpu.memory_space<vmem>>, vector<1x128xf32>
    %20 = vector.broadcast %19 : vector<1x128xf32> to vector<8x128xf32>
    %21 = arith.addf %18, %20 : vector<8x128xf32>
    %22 = arith.negf %21 : vector<8x128xf32>
    %23 = math.exp %22 : vector<8x128xf32>
    %cst_17 = arith.constant 1.000000e+00 : f32
    %24 = vector.broadcast %cst_17 : f32 to vector<8x128xf32>
    %25 = arith.addf %24, %23 : vector<8x128xf32>
    %26 = arith.divf %24, %25 : vector<8x128xf32>
    %c0_18 = arith.constant 0 : index
    %c0_19 = arith.constant 0 : index
    %27 = vector.load %arg8[%c0_18, %c0_19] : memref<8x128xf32, #tpu.memory_space<vmem>>, vector<8x128xf32>
    tpu.vector_store %arg8[%c0_18, %c0_19], %26 {strides = array<i32>} : memref<8x128xf32, #tpu.memory_space<vmem>>, vector<8x128xf32>,
    return
  }
  func.func @transform_0(%arg0: i32) -> (i32, i32) {
    %c0_i32 = arith.constant 0 : i32
    %c0_i32_0 = arith.constant 0 : i32
    return %arg0, %c0_i32 : i32, i32
  }
  func.func @transform_1(%arg0: i32) -> (i32, i32) {
    %c0_i32 = arith.constant 0 : i32
    %c0_i32_0 = arith.constant 0 : i32
    %c0_i32_1 = arith.constant 0 : i32
    return %c0_i32, %c0_i32_0 : i32, i32
  }
  func.func @transform_2(%arg0: i32) -> (i32, i32) {
    %c0_i32 = arith.constant 0 : i32
    %c0_i32_0 = arith.constant 0 : i32
    %c0_i32_1 = arith.constant 0 : i32
    return %c0_i32, %c0_i32_0 : i32, i32
  }
  func.func @transform_3(%arg0: i32) -> (i32, i32) {
    %c0_i32 = arith.constant 0 : i32
    %c0_i32_0 = arith.constant 0 : i32
    %c0_i32_1 = arith.constant 0 : i32
    return %c0_i32, %c0_i32_0 : i32, i32
  }
  func.func @transform_4(%arg0: i32) -> (i32, i32) {
    %c0_i32 = arith.constant 0 : i32
    %c0_i32_0 = arith.constant 0 : i32
    %c0_i32_1 = arith.constant 0 : i32
    return %c0_i32, %c0_i32_0 : i32, i32
  }
  func.func @transform_5(%arg0: i32) -> (i32, i32) {
    %c0_i32 = arith.constant 0 : i32
    %c0_i32_0 = arith.constant 0 : i32
    %c0_i32_1 = arith.constant 0 : i32
    return %c0_i32, %c0_i32_0 : i32, i32
  }
  func.func @transform_6(%arg0: i32) -> (i32, i32) {
    %c0_i32 = arith.constant 0 : i32
    %c0_i32_0 = arith.constant 0 : i32
    %c0_i32_1 = arith.constant 0 : i32
    return %c0_i32, %c0_i32_0 : i32, i32
  }
  func.func @transform_7(%arg0: i32) -> (i32, i32) {
    %c0_i32 = arith.constant 0 : i32
    %c0_i32_0 = arith.constant 0 : i32
    return %arg0, %c0_i32 : i32, i32
  }
}

</mosaic_0001>

<bundles_post_ra>
// kernel: tpu_custom_call.1
= control target key start
LH: loop header
LB: loop body
LE: loop exit
PB: predicated region body
PF: predicated region fallthrough
CT: control target
= control target key end

     0   :  { %12 = vsyncpa [#allocation3], 0  ;;  %s466_s0 = inlined_call_operand.hbm [shape: f32[8,128], index: 0, kind: input, shape index: {}]   ;;  %s467_s1 = inlined_call_operand.hbm [shape: f32[128,128], index: 1, kind: input, shape index: {}]   ;;  %s468_s2 = inlined_call_operand.vmem [shape: f32[1,128], index: 2, kind: input, shape index: {}]   ;;  %s469_s3 = inlined_call_operand.hbm [shape: f32[128,128], index: 3, kind: input, shape index: {}]   ;;  %s470_s4 = inlined_call_operand.vmem [shape: f32[1,128], index: 4, kind: input, shape index: {}]   ;;  %s471_s5 = inlined_call_operand.hbm [shape: f32[128,128], index: 5, kind: input, shape index: {}]   ;;  %s472_s6 = inlined_call_operand.vmem [shape: f32[1,128], index: 6, kind: input, shape index: {}]   ;;  %s473_s7 = inlined_call_operand.hbm [shape: f32[8,128], index: 7, kind: output, shape index: {}]  }
   0x1   :  { %13 = vsyncpa [#allocation6], 0 }
   0x2   :  { %14 = vsyncpa [#allocation9], 0  ;;  %s31_s26 = sshll.u32 %s467_s1, 4  ;;  %s32_s26 = int_to_ptr.hbm [resolvable:$true] %s31_s26 }
   0x3   :  { %15 = vsyncpa [#allocation4], 0  ;;  %s395_s27 = smov [#allocation5]   ;;  %s21_s8 = sshll.u32 %s466_s0, 4  ;;  %s22_s8 = int_to_ptr.hbm [resolvable:$true] %s21_s8 }
   0x4   :  { %s33_s28 = sshll.u32 %s395_s27, 4  ;;  %s396_s9 = smov 128   ;;  %s34_s28 = int_to_ptr.vmem [resolvable:$true] %s33_s28 }
   0x5   :  { %s397_s10 = smov 8   ;;  %s398_s11 = smov [#allocation2]  }
   0x6   :  { %39 = dma.hbm_to_vmem [thread:$0]  %s32_s26, 2048, %s34_s28, [#allocation6], %s396_s9, %s396_s9, %s397_s10  }
   0x7   :  { %s23_s12 = sshll.u32 %s398_s11, 4  ;;  %s46_s15 = sshll.u32 %s469_s3, 4  ;;  %s24_s12 = int_to_ptr.vmem [resolvable:$true] %s23_s12  ;;  %s47_s15 = int_to_ptr.hbm [resolvable:$true] %s46_s15 }
   0x8   :  { %26 = dma.hbm_to_vmem [thread:$0]  %s22_s8, 128, %s24_s12, [#allocation3]  }
   0x9   :  { %s61_s17 = sshll.u32 %s471_s5, 4  ;;  %s399_s18 = smov [#allocation7]   ;;  %s62_s17 = int_to_ptr.hbm [resolvable:$true] %s61_s17 }
   0xa   :  { %s48_s19 = sshll.u32 %s399_s18, 4  ;;  %s400_s0 = smov [#allocation8]   ;;  %s49_s19 = int_to_ptr.vmem [resolvable:$true] %s48_s19 }
   0xb   :  { %54 = dma.hbm_to_vmem [thread:$0]  %s47_s15, 2048, %s49_s19, [#allocation6], %s396_s9, %s396_s9, %s397_s10  }
   0xc   :  { %s63_s20 = sshll.u32 %s400_s0, 4  ;;  %s64_s20 = int_to_ptr.vmem [resolvable:$true] %s63_s20 }
   0xd   :  { %69 = dma.hbm_to_vmem [thread:$0]  %s62_s17, 2048, %s64_s20, [#allocation9], %s396_s9, %s396_s9, %s397_s10  }
   0xe   :  { %387 = dma.done.wait [#allocation3], 128  }
   0xf   :  { %388 = vsyncadd [#allocation3], 4294967168 }
  0x10   :  { %389 = dma.done.wait [#allocation6], 4096  }
  0x11   :  { %390 = vsyncadd [#allocation6], 4294963200 }
  0x12   :  { %391 = dma.done.wait [#allocation9], 2048  }
  0x13   :  { %392 = vsyncadd [#allocation9], 4294965248  ;;  %v104_v0 = vld [vmem:[#allocation5 + $0x78] sm:$0xff]  ;;  %v103_v1 = vld [vmem:[#allocation5 + $0x70] sm:$0xff] }
  0x14   :  { %109 = vmatpush.msra.mxu0 %v104_v0  ;;  %v102_v2 = vld [vmem:[#allocation5 + $0x68] sm:$0xff]  ;;  %v101_v3 = vld [vmem:[#allocation5 + $0x60] sm:$0xff]  ;;  %v146_v4 = vld [vmem:[#allocation7 + $0x78] sm:$0xff] }
  0x15   :  { %v100_v5 = vld [vmem:[#allocation5 + $0x58] sm:$0xff]  ;;  %151 = vmatpush.msra.mxu1 %v146_v4  ;;  %v145_v6 = vld [vmem:[#allocation7 + $0x70] sm:$0xff]  ;;  %v144_v7 = vld [vmem:[#allocation7 + $0x68] sm:$0xff] }
  0x16   :  { %110 = vmatpush.msra.mxu0 %v103_v1  ;;  %v99_v8 = vld [vmem:[#allocation5 + $0x50] sm:$0xff]  ;;  %v143_v9 = vld [vmem:[#allocation7 + $0x60] sm:$0xff]  ;;  %v98_v10 = vld [vmem:[#allocation5 + $0x48] sm:$0xff] }
  0x17   :  { %152 = vmatpush.msra.mxu1 %v145_v6  ;;  %v142_v11 = vld [vmem:[#allocation7 + $0x58] sm:$0xff]  ;;  %v97_v12 = vld [vmem:[#allocation5 + $0x40] sm:$0xff]  ;;  %v141_v13 = vld [vmem:[#allocation7 + $0x50] sm:$0xff] }
  0x18   :  { %111 = vmatpush.msra.mxu0 %v102_v2  ;;  %v96_v14 = vld [vmem:[#allocation5 + $0x38] sm:$0xff]  ;;  %v140_v15 = vld [vmem:[#allocation7 + $0x48] sm:$0xff]  ;;  %v95_v16 = vld [vmem:[#allocation5 + $0x30] sm:$0xff] }
  0x19   :  { %153 = vmatpush.msra.mxu1 %v144_v7  ;;  %v139_v17 = vld [vmem:[#allocation7 + $0x40] sm:$0xff]  ;;  %v94_v18 = vld [vmem:[#allocation5 + $0x28] sm:$0xff]  ;;  %v138_v19 = vld [vmem:[#allocation7 + $0x38] sm:$0xff] }
  0x1a   :  { %112 = vmatpush.msra.mxu0 %v101_v3  ;;  %v93_v20 = vld [vmem:[#allocation5 + $0x20] sm:$0xff]  ;;  %v137_v21 = vld [vmem:[#allocation7 + $0x30] sm:$0xff]  ;;  %v92_v22 = vld [vmem:[#allocation5 + $0x18] sm:$0xff] }
  0x1b   :  { %154 = vmatpush.msra.mxu1 %v143_v9  ;;  %v136_v23 = vld [vmem:[#allocation7 + $0x28] sm:$0xff]  ;;  %v91_v24 = vld [vmem:[#allocation5 + $0x10] sm:$0xff]  ;;  %v135_v25 = vld [vmem:[#allocation7 + $0x20] sm:$0xff] }
  0x1c   :  { %113 = vmatpush.msra.mxu0 %v100_v5  ;;  %v90_v26 = vld [vmem:[#allocation5 + $0x8] sm:$0xff]  ;;  %v89_v27 = vld [vmem:[#allocation5] sm:$0xff]  ;;  %v88_v28 = vld [vmem:[#allocation2] sm:$0xff] }
  0x1d   :  { %155 = vmatpush.msra.mxu1 %v142_v11  ;;  %v134_v29 = vld [vmem:[#allocation7 + $0x18] sm:$0xff]  ;;  %v133_v30 = vld [vmem:[#allocation7 + $0x10] sm:$0xff]  ;;  %v132_v31 = vld [vmem:[#allocation7 + $0x8] sm:$0xff] }
  0x1e   :  { %114 = vmatpush.msra.mxu0 %v99_v8  ;;  %v131_v32 = vld [vmem:[#allocation7] sm:$0xff]  ;;  %v188_v33 = vld [vmem:[#allocation8 + $0x78] sm:$0xff]  ;;  %v187_v34 = vld [vmem:[#allocation8 + $0x70] sm:$0xff] }
  0x1f   :  { %156 = vmatpush.msra.mxu1 %v141_v13  ;;  %193 = vmatpush.msra.mxu2 %v188_v33  ;;  %v186_v35 = vld [vmem:[#allocation8 + $0x68] sm:$0xff]  ;;  %v185_v36 = vld [vmem:[#allocation8 + $0x60] sm:$0xff]  ;;  %v184_v37 = vld [vmem:[#allocation8 + $0x58] sm:$0xff] }
  0x20   :  { %115 = vmatpush.msra.mxu0 %v98_v10  ;;  %v183_v38 = vld [vmem:[#allocation8 + $0x50] sm:$0xff]  ;;  %v182_v39 = vld [vmem:[#allocation8 + $0x48] sm:$0xff]  ;;  %v181_v40 = vld [vmem:[#allocation8 + $0x40] sm:$0xff] }
  0x21   :  { %157 = vmatpush.msra.mxu1 %v140_v15  ;;  %194 = vmatpush.msra.mxu2 %v187_v34  ;;  %v180_v41 = vld [vmem:[#allocation8 + $0x38] sm:$0xff]  ;;  %v179_v42 = vld [vmem:[#allocation8 + $0x30] sm:$0xff]  ;;  %v178_v43 = vld [vmem:[#allocation8 + $0x28] sm:$0xff] }
  0x22   :  { %116 = vmatpush.msra.mxu0 %v97_v12  ;;  %v177_v44 = vld [vmem:[#allocation8 + $0x20] sm:$0xff]  ;;  %v260_v45 = vld [vmem:[%s468_s2] ss:$0 sm:$0xff]  ;;  %v175_v51 = vld [vmem:[#allocation8 + $0x10] sm:$0xff] }
  0x23   :  { %158 = vmatpush.msra.mxu1 %v139_v17  ;;  %195 = vmatpush.msra.mxu2 %v186_v35  ;;  %v176_v50 = vld [vmem:[#allocation8 + $0x18] sm:$0xff]  ;;  %v174_v52 = vld [vmem:[#allocation8 + $0x8] sm:$0xff]  ;;  %v173_v53 = vld [vmem:[#allocation8] sm:$0xff] }
  0x24   :  { %117 = vmatpush.msra.mxu0 %v96_v14  ;;  %v261_v54 = vld [vmem:[%s470_s4] ss:$0 sm:$0xff]  ;;  %s401_s4 = smov [#allocation10]  }
  0x25   :  { %159 = vmatpush.msra.mxu1 %v138_v19  ;;  %196 = vmatpush.msra.mxu2 %v185_v36  ;;  %v262_v59 = vld [vmem:[%s472_s6] ss:$0 sm:$0xff]  ;;  %s238_s24 = sshll.u32 %s401_s4, 4  ;;  %s240_s6 = sshll.u32 %s473_s7, 4  ;;  %s239_s24 = int_to_ptr.vmem [resolvable:$true] %s238_s24  ;;  %s241_s6 = int_to_ptr.hbm [resolvable:$true] %s240_s6 }
  0x26   :  { %118 = vmatpush.msra.mxu0 %v95_v16 }
  0x27   :  { %160 = vmatpush.msra.mxu1 %v137_v21  ;;  %197 = vmatpush.msra.mxu2 %v184_v37 }
  0x28   :  { %119 = vmatpush.msra.mxu0 %v94_v18 }
  0x29   :  { %161 = vmatpush.msra.mxu1 %v136_v23  ;;  %198 = vmatpush.msra.mxu2 %v183_v38 }
  0x2a   :  { %120 = vmatpush.msra.mxu0 %v93_v20 }
  0x2b   :  { %162 = vmatpush.msra.mxu1 %v135_v25  ;;  %199 = vmatpush.msra.mxu2 %v182_v39 }
  0x2c   :  { %121 = vmatpush.msra.mxu0 %v92_v22 }
  0x2d   :  { %163 = vmatpush.msra.mxu1 %v134_v29  ;;  %200 = vmatpush.msra.mxu2 %v181_v40 }
  0x2e   :  { %122 = vmatpush.msra.mxu0 %v91_v24 }
  0x2f   :  { %164 = vmatpush.msra.mxu1 %v133_v30  ;;  %201 = vmatpush.msra.mxu2 %v180_v41 }
  0x30   :  { %123 = vmatpush.msra.mxu0 %v90_v26 }
  0x31   :  { %165 = vmatpush.msra.mxu1 %v132_v31  ;;  %202 = vmatpush.msra.mxu2 %v179_v42 }
  0x32   :  { %124 = vmatpush.msra.mxu0 %v89_v27 }
  0x33   :  { %125 = vmatmul.f32.vlgmr.msra.gmra.mxu0 %v88_v28  ;;  %166 = vmatpush.msra.mxu1 %v131_v32 }
  0x34   :  { %203 = vmatpush.msra.mxu2 %v178_v43 }
  0x36   :  { %204 = vmatpush.msra.mxu2 %v177_v44 }
  0x38   :  { %205 = vmatpush.msra.mxu2 %v176_v50 }
  0x3a   :  { %206 = vmatpush.msra.mxu2 %v175_v51 }
  0x3c   :  { %207 = vmatpush.msra.mxu2 %v174_v52 }
  0x3e   :  { %208 = vmatpush.msra.mxu2 %v173_v53 }
  0xb0   :  { %v126_v46 = vpop.f32.mrf.mxu0 }
  0xb1   :  { %v127_v47 = vadd.f32 %v260_v45, %v126_v46 }
  0xb3   :  { %v129_v48 = vmul.f32 0.01, %v127_v47 }
  0xb5   :  { %v130_v49 = vmax.f32 %v127_v47, %v129_v48 }
  0xb7   :  { %167 = vmatmul.f32.vlgmr.msra.gmra.mxu1 %v130_v49 }
 0x134   :  { %v168_v55 = vpop.f32.mrf.mxu1 }
 0x135   :  { %v169_v56 = vadd.f32 %v261_v54, %v168_v55 }
 0x137   :  { %v171_v57 = vmul.f32 0.01, %v169_v56 }
 0x139   :  { %v172_v58 = vmax.f32 %v169_v56, %v171_v57 }
 0x13b   :  { %209 = vmatmul.f32.vlgmr.msra.gmra.mxu2 %v172_v58 }
 0x1be   :  { %v210_v60 = vpop.f32.mrf.mxu2 }
 0x1bf   :  { %v211_v61 = vadd.f32 %v262_v59, %v210_v60 }
 0x1c1   :  { %v252_v62 = vmul.f32 -1.442695, %v211_v61 }
 0x1c3   :  { %263 = vpow2.f32 %v252_v62 }
 0x1c9   :  { %v264_v63 = vpop.eup %263 }
 0x1ca   :  { %v216_v0 = vadd.f32 1.0, %v264_v63 }
 0x1cc   :  { %265 = vrcp.f32 %v216_v0  ;;  %v228_v4 = vand.u32 2147483648, %v216_v0  ;;  %v226_v6 = vand.u32 2147483647, %v216_v0  ;;  %vm222_vm1 = vweird.f32 %v216_v0 }
 0x1ce   :  { %v229_v8 = vor.u32 1.1754944e-38, %v228_v4  ;;  %vm227_vm3 = vcmp.eq.f32.partialorder %v226_v6, 8.507059e+37 }
 0x1d2   :  { %v266_v1 = vpop.eup %265 }
 0x1d3   :  { %v218_v2 = vmul.f32 %v266_v1, %v216_v0  ;;  %vm223_vm0 = vweird.f32 %v266_v1 }
 0x1d4   :  { %vm224_vm2 = vmor %vm222_vm1, %vm223_vm0 }
 0x1d5   :  { %v219_v3 = vsub.f32 1.0, %v218_v2 }
 0x1d7   :  { %v220_v5 = vmul.f32 %v266_v1, %v219_v3 }
 0x1d9   :  { %v221_v7 = vadd.f32 %v266_v1, %v220_v5 }
 0x1db   :  { %v225_v9 = vsel %vm224_vm2, %v266_v1, %v221_v7 }
 0x1dc   :  { %v230_v10 = vsel %vm227_vm3, %v229_v8, %v225_v9 }
 0x1dd   :  { %232 = vst [vmem:[#allocation10] sm:$0xff] %v230_v10 }
 0x1de   :  { %243 = dma.vmem_to_hbm [thread:$0]  %s239_s24, 128, %s241_s6, [#allocation4]  }
 0x1df   :  { %393 = dma.done.wait [#allocation4], 128  }
 0x1e0   :  { %394 = vsyncadd [#allocation4], 4294967168 }
 0x1e1   :  { %248 = vsyncpa [#allocation3], 1 }
 0x1e2   :  { %249 = vsyncpa [#allocation6], 1 }
 0x1e3   :  { %250 = vsyncpa [#allocation9], 1 }
 0x1e4   :  { %251 = vsyncpa [#allocation4], 1 }

</bundles_post_ra>
